<compile_context>
chip_gen: v6e
topology: v6e:2x2x1
jax: 0.10.0
libtpu: 0.0.40
codegen_flags: <defaults>
</compile_context>

<pallas_src>
import jax
import jax.numpy as jnp
from jax.experimental import pallas as pl
from jax.experimental.pallas import tpu as pltpu

NUM_INPUTS = 23   # len(pick) in the PyTorch module
HIDDEN = 100      # logical hidden width of fc1/fc2/fc3

K_PAD = 32        # input features padded to a sublane-friendly multiple of 8
H_PAD = 128       # hidden dim padded to one full lane width
O_PAD = 128       # lane-dense output slab; real output lives in column 0
TILE_B = 128      # batch rows per grid step


def mlp_kernel(x_ref,
               w1_ref, b1_ref,
               w2_ref, b2_ref,
               w3_ref, b3_ref,
               w4_ref, b4_ref,
               o_ref):
    # bf16 operands into the MXU, f32 accumulation; bias add + ReLU in f32 on the VPU.
    x = x_ref[...].astype(jnp.bfloat16)

    h = jnp.dot(x, w1_ref[...], preferred_element_type=jnp.float32) + b1_ref[...]
    h = jnp.maximum(h, 0.0)

    h = jnp.dot(h.astype(jnp.bfloat16), w2_ref[...],
                preferred_element_type=jnp.float32) + b2_ref[...]
    h = jnp.maximum(h, 0.0)

    h = jnp.dot(h.astype(jnp.bfloat16), w3_ref[...],
                preferred_element_type=jnp.float32) + b3_ref[...]
    h = jnp.maximum(h, 0.0)

    out = jnp.dot(h.astype(jnp.bfloat16), w4_ref[...],
                  preferred_element_type=jnp.float32) + b4_ref[...]
    # No ReLU after fc4 (matches the PyTorch module).
    o_ref[...] = out.astype(o_ref.dtype)


def mlp_forward(x, padded_params, tile_b=TILE_B):
    """x: (B, NUM_INPUTS) f32. padded_params: output of pad_params(). Returns (B, 1) f32."""
    (w1, b1), (w2, b2), (w3, b3), (w4, b4) = padded_params
    B = x.shape[0]
    b_pad = pl.cdiv(B, tile_b) * tile_b

    # Zero-pad batch to a tile multiple and features 23 -> 32.
    x_p = jnp.zeros((b_pad, K_PAD), jnp.float32).at[:B, :NUM_INPUTS].set(
        x.astype(jnp.float32))

    flops = 2 * b_pad * (K_PAD * H_PAD + H_PAD * H_PAD + H_PAD * H_PAD + H_PAD * O_PAD)
    bytes_accessed = (
        x_p.size * 4 + b_pad * O_PAD * 4                     # x in, out slab
        + (w1.size + w2.size + w3.size + w4.size) * 2        # bf16 weights
        + (b1.size + b2.size + b3.size + b4.size) * 4)       # f32 biases

    resident = lambda i: (0, 0)  # weights/biases stay VMEM-resident across batch tiles

    out_pad = pl.pallas_call(
        mlp_kernel,
        out_shape=jax.ShapeDtypeStruct((b_pad, O_PAD), jnp.float32),
        grid=(b_pad // tile_b,),
        in_specs=[
            pl.BlockSpec((tile_b, K_PAD), lambda i: (i, 0)),   # x tile
            pl.BlockSpec((K_PAD, H_PAD), resident),            # w1
            pl.BlockSpec((1, H_PAD), resident),                # b1
            pl.BlockSpec((H_PAD, H_PAD), resident),            # w2
            pl.BlockSpec((1, H_PAD), resident),                # b2
            pl.BlockSpec((H_PAD, H_PAD), resident),            # w3
            pl.BlockSpec((1, H_PAD), resident),                # b3
            pl.BlockSpec((H_PAD, O_PAD), resident),            # w4
            pl.BlockSpec((1, O_PAD), resident),                # b4
        ],
        out_specs=pl.BlockSpec((tile_b, O_PAD), lambda i: (i, 0)),
        compiler_params=pltpu.CompilerParams(
            dimension_semantics=("parallel",)),
        cost_estimate=pl.CostEstimate(
            flops=flops, transcendentals=0, bytes_accessed=bytes_accessed),
    )(x_p, w1, b1, w2, b2, w3, b3, w4, b4)

    # Slice away batch padding and the lane-padded output columns.
    return out_pad[:B, :1]


def init_params(key):
    """Deterministic init matching nn.Linear's uniform(-1/sqrt(fan_in), +) scheme.
    Weights are kept as (in, out) = PyTorch weight transposed, so the kernel
    computes x @ W + b with identical math."""
    def linear(key, fan_in, fan_out):
        kw, kb = jax.random.split(key)
        bound = 1.0 / jnp.sqrt(fan_in)
        w = jax.random.uniform(kw, (fan_out, fan_in), jnp.float32, -bound, bound).T
        b = jax.random.uniform(kb, (1, fan_out), jnp.float32, -bound, bound)
        return w, b

    k1, k2, k3, k4 = jax.random.split(key, 4)
    return [
        linear(k1, NUM_INPUTS, HIDDEN),
        linear(k2, HIDDEN, HIDDEN),
        linear(k3, HIDDEN, HIDDEN),
        linear(k4, HIDDEN, 1),
    ]


def pad_params(params):
    """Zero-pad every layer to lane/sublane-aligned shapes; cast weights to bf16.
    Zero-padded weight rows/cols + zero bias padding keep the padded activation
    columns exactly 0 through every ReLU, so real outputs are unchanged."""
    dims = [(K_PAD, H_PAD), (H_PAD, H_PAD), (H_PAD, H_PAD), (H_PAD, O_PAD)]
    padded = []
    for (w, b), (ip, op) in zip(params, dims):
        wp = (jnp.zeros((ip, op), jnp.float32)
              .at[:w.shape[0], :w.shape[1]].set(w)
              .astype(jnp.bfloat16))
        bp = jnp.zeros((1, op), jnp.float32).at[:, :b.shape[1]].set(b)
        padded.append((wp, bp))
    return padded


def reference_forward(x, padded_params):
    """Pure-JAX reference mirroring the kernel's numerics (bf16 operands, f32 accum)."""
    B = x.shape[0]
    h = jnp.zeros((B, K_PAD), jnp.float32).at[:, :NUM_INPUTS].set(x.astype(jnp.float32))
    for i, (w, b) in enumerate(padded_params):
        h = jnp.dot(h.astype(jnp.bfloat16), w,
                    preferred_element_type=jnp.float32) + b
        if i < 3:
            h = jnp.maximum(h, 0.0)
    return h[:, :1]


if __name__ == "__main__":
    key = jax.random.PRNGKey(0)
    kx, kp = jax.random.split(key)

    batch = 8
    x = jax.random.normal(kx, (batch, NUM_INPUTS), dtype=jnp.float32)
    params = init_params(kp)
    padded = pad_params(params)

    out = mlp_forward(x, padded)
    out = jax.block_until_ready(out)

    ref = reference_forward(x, padded)
    assert out.shape == (batch, 1), out.shape
    assert jnp.allclose(out, ref, atol=2e-3, rtol=2e-3), "mismatch vs reference"

    print("KERNEL_OK")
</pallas_src>

<mosaic_0001>
module attributes {stable_mosaic.version = 11 : i64} {
  func.func @mlp_kernel(%arg0: i32, %arg1: memref<128x32xf32, #tpu.memory_space<vmem>>, %arg2: memref<32x128xbf16, #tpu.memory_space<vmem>>, %arg3: memref<1x128xf32, #tpu.memory_space<vmem>>, %arg4: memref<128x128xbf16, #tpu.memory_space<vmem>>, %arg5: memref<1x128xf32, #tpu.memory_space<vmem>>, %arg6: memref<128x128xbf16, #tpu.memory_space<vmem>>, %arg7: memref<1x128xf32, #tpu.memory_space<vmem>>, %arg8: memref<128x128xbf16, #tpu.memory_space<vmem>>, %arg9: memref<1x128xf32, #tpu.memory_space<vmem>>, %arg10: memref<128x128xf32, #tpu.memory_space<vmem>>) attributes {dimension_semantics = [#tpu.dimension_semantics<parallel>], iteration_bounds = array<i64: 1>, scalar_prefetch = 0 : i64, scratch_operands = 0 : i64, tpu.core_type = #tpu.core_type<tc>, window_params = [{transform_indices = @transform_0, window_bounds = array<i64: 128, 32>}, {pipeline_mode = #tpu.pipeline_mode<synchronous>, transform_indices = @transform_1, window_bounds = array<i64: 32, 128>}, {pipeline_mode = #tpu.pipeline_mode<synchronous>, transform_indices = @transform_2, window_bounds = array<i64: 1, 128>}, {pipeline_mode = #tpu.pipeline_mode<synchronous>, transform_indices = @transform_3, window_bounds = array<i64: 128, 128>}, {pipeline_mode = #tpu.pipeline_mode<synchronous>, transform_indices = @transform_4, window_bounds = array<i64: 1, 128>}, {pipeline_mode = #tpu.pipeline_mode<synchronous>, transform_indices = @transform_5, window_bounds = array<i64: 128, 128>}, {pipeline_mode = #tpu.pipeline_mode<synchronous>, transform_indices = @transform_6, window_bounds = array<i64: 1, 128>}, {pipeline_mode = #tpu.pipeline_mode<synchronous>, transform_indices = @transform_7, window_bounds = array<i64: 128, 128>}, {pipeline_mode = #tpu.pipeline_mode<synchronous>, transform_indices = @transform_8, window_bounds = array<i64: 1, 128>}, {transform_indices = @transform_9, window_bounds = array<i64: 128, 128>}]} {
    %c0 = arith.constant 0 : index
    %c0_0 = arith.constant 0 : index
    %0 = vector.load %arg1[%c0, %c0_0] : memref<128x32xf32, #tpu.memory_space<vmem>>, vector<128x32xf32>
    %1 = arith.truncf %0 : vector<128x32xf32> to vector<128x32xbf16>
    %c0_1 = arith.constant 0 : index
    %c0_2 = arith.constant 0 : index
    %2 = vector.load %arg2[%c0_1, %c0_2] : memref<32x128xbf16, #tpu.memory_space<vmem>>, vector<32x128xbf16>
    %cst = arith.constant dense<0.000000e+00> : vector<128x128xf32>
    %3 = tpu.matmul %1, %2, %cst {dimension_numbers = #tpu.dot_dimension_numbers<[1], [0], [0], [1], [0, 0, 1, 1], [], []>} : vector<128x32xbf16>, vector<32x128xbf16>, vector<128x128xf32> -> vector<128x128xf32>
    %c0_3 = arith.constant 0 : index
    %c0_4 = arith.constant 0 : index
    %4 = vector.load %arg3[%c0_3, %c0_4] : memref<1x128xf32, #tpu.memory_space<vmem>>, vector<1x128xf32>
    %5 = vector.broadcast %4 : vector<1x128xf32> to vector<128x128xf32>
    %6 = arith.addf %3, %5 : vector<128x128xf32>
    %cst_5 = arith.constant 0.000000e+00 : f32
    %7 = vector.broadcast %cst_5 : f32 to vector<128x128xf32>
    %8 = arith.maximumf %6, %7 : vector<128x128xf32>
    %9 = arith.truncf %8 : vector<128x128xf32> to vector<128x128xbf16>
    %c0_6 = arith.constant 0 : index
    %c0_7 = arith.constant 0 : index
    %10 = vector.load %arg4[%c0_6, %c0_7] : memref<128x128xbf16, #tpu.memory_space<vmem>>, vector<128x128xbf16>
    %cst_8 = arith.constant dense<0.000000e+00> : vector<128x128xf32>
    %11 = tpu.matmul %9, %10, %cst_8 {dimension_numbers = #tpu.dot_dimension_numbers<[1], [0], [0], [1], [0, 0, 1, 1], [], []>} : vector<128x128xbf16>, vector<128x128xbf16>, vector<128x128xf32> -> vector<128x128xf32>
    %c0_9 = arith.constant 0 : index
    %c0_10 = arith.constant 0 : index
    %12 = vector.load %arg5[%c0_9, %c0_10] : memref<1x128xf32, #tpu.memory_space<vmem>>, vector<1x128xf32>
    %13 = vector.broadcast %12 : vector<1x128xf32> to vector<128x128xf32>
    %14 = arith.addf %11, %13 : vector<128x128xf32>
    %cst_11 = arith.constant 0.000000e+00 : f32
    %15 = vector.broadcast %cst_11 : f32 to vector<128x128xf32>
    %16 = arith.maximumf %14, %15 : vector<128x128xf32>
    %17 = arith.truncf %16 : vector<128x128xf32> to vector<128x128xbf16>
    %c0_12 = arith.constant 0 : index
    %c0_13 = arith.constant 0 : index
    %18 = vector.load %arg6[%c0_12, %c0_13] : memref<128x128xbf16, #tpu.memory_space<vmem>>, vector<128x128xbf16>
    %cst_14 = arith.constant dense<0.000000e+00> : vector<128x128xf32>
    %19 = tpu.matmul %17, %18, %cst_14 {dimension_numbers = #tpu.dot_dimension_numbers<[1], [0], [0], [1], [0, 0, 1, 1], [], []>} : vector<128x128xbf16>, vector<128x128xbf16>, vector<128x128xf32> -> vector<128x128xf32>
    %c0_15 = arith.constant 0 : index
    %c0_16 = arith.constant 0 : index
    %20 = vector.load %arg7[%c0_15, %c0_16] : memref<1x128xf32, #tpu.memory_space<vmem>>, vector<1x128xf32>
    %21 = vector.broadcast %20 : vector<1x128xf32> to vector<128x128xf32>
    %22 = arith.addf %19, %21 : vector<128x128xf32>
    %cst_17 = arith.constant 0.000000e+00 : f32
    %23 = vector.broadcast %cst_17 : f32 to vector<128x128xf32>
    %24 = arith.maximumf %22, %23 : vector<128x128xf32>
    %25 = arith.truncf %24 : vector<128x128xf32> to vector<128x128xbf16>
    %c0_18 = arith.constant 0 : index
    %c0_19 = arith.constant 0 : index
    %26 = vector.load %arg8[%c0_18, %c0_19] : memref<128x128xbf16, #tpu.memory_space<vmem>>, vector<128x128xbf16>
    %cst_20 = arith.constant dense<0.000000e+00> : vector<128x128xf32>
    %27 = tpu.matmul %25, %26, %cst_20 {dimension_numbers = #tpu.dot_dimension_numbers<[1], [0], [0], [1], [0, 0, 1, 1], [], []>} : vector<128x128xbf16>, vector<128x128xbf16>, vector<128x128xf32> -> vector<128x128xf32>
    %c0_21 = arith.constant 0 : index
    %c0_22 = arith.constant 0 : index
    %28 = vector.load %arg9[%c0_21, %c0_22] : memref<1x128xf32, #tpu.memory_space<vmem>>, vector<1x128xf32>
    %29 = vector.broadcast %28 : vector<1x128xf32> to vector<128x128xf32>
    %30 = arith.addf %27, %29 : vector<128x128xf32>
    %c0_23 = arith.constant 0 : index
    %c0_24 = arith.constant 0 : index
    %31 = vector.load %arg10[%c0_23, %c0_24] : memref<128x128xf32, #tpu.memory_space<vmem>>, vector<128x128xf32>
    tpu.vector_store %arg10[%c0_23, %c0_24], %30 {strides = array<i32>} : memref<128x128xf32, #tpu.memory_space<vmem>>, vector<128x128xf32>,
    return
  }
  func.func @transform_0(%arg0: i32) -> (i32, i32) {
    %c0_i32 = arith.constant 0 : i32
    %c0_i32_0 = arith.constant 0 : i32
    return %arg0, %c0_i32 : i32, i32
  }
  func.func @transform_1(%arg0: i32) -> (i32, i32) {
    %c0_i32 = arith.constant 0 : i32
    %c0_i32_0 = arith.constant 0 : i32
    %c0_i32_1 = arith.constant 0 : i32
    return %c0_i32, %c0_i32_0 : i32, i32
  }
  func.func @transform_2(%arg0: i32) -> (i32, i32) {
    %c0_i32 = arith.constant 0 : i32
    %c0_i32_0 = arith.constant 0 : i32
    %c0_i32_1 = arith.constant 0 : i32
    return %c0_i32, %c0_i32_0 : i32, i32
  }
  func.func @transform_3(%arg0: i32) -> (i32, i32) {
    %c0_i32 = arith.constant 0 : i32
    %c0_i32_0 = arith.constant 0 : i32
    %c0_i32_1 = arith.constant 0 : i32
    return %c0_i32, %c0_i32_0 : i32, i32
  }
  func.func @transform_4(%arg0: i32) -> (i32, i32) {
    %c0_i32 = arith.constant 0 : i32
    %c0_i32_0 = arith.constant 0 : i32
    %c0_i32_1 = arith.constant 0 : i32
    return %c0_i32, %c0_i32_0 : i32, i32
  }
  func.func @transform_5(%arg0: i32) -> (i32, i32) {
    %c0_i32 = arith.constant 0 : i32
    %c0_i32_0 = arith.constant 0 : i32
    %c0_i32_1 = arith.constant 0 : i32
    return %c0_i32, %c0_i32_0 : i32, i32
  }
  func.func @transform_6(%arg0: i32) -> (i32, i32) {
    %c0_i32 = arith.constant 0 : i32
    %c0_i32_0 = arith.constant 0 : i32
    %c0_i32_1 = arith.constant 0 : i32
    return %c0_i32, %c0_i32_0 : i32, i32
  }
  func.func @transform_7(%arg0: i32) -> (i32, i32) {
    %c0_i32 = arith.constant 0 : i32
    %c0_i32_0 = arith.constant 0 : i32
    %c0_i32_1 = arith.constant 0 : i32
    return %c0_i32, %c0_i32_0 : i32, i32
  }
  func.func @transform_8(%arg0: i32) -> (i32, i32) {
    %c0_i32 = arith.constant 0 : i32
    %c0_i32_0 = arith.constant 0 : i32
    %c0_i32_1 = arith.constant 0 : i32
    return %c0_i32, %c0_i32_0 : i32, i32
  }
  func.func @transform_9(%arg0: i32) -> (i32, i32) {
    %c0_i32 = arith.constant 0 : i32
    %c0_i32_0 = arith.constant 0 : i32
    return %arg0, %c0_i32 : i32, i32
  }
}

</mosaic_0001>

<bundles_post_ra>
// kernel: tpu_custom_call.1
= control target key start
LH: loop header
LB: loop body
LE: loop exit
PB: predicated region body
PF: predicated region fallthrough
CT: control target
= control target key end

     0   :  { %14 = vsyncpa [#allocation3], 0  ;;  %s1320_s0 = inlined_call_operand.vmem [shape: f32[128,32], index: 0, kind: input, shape index: {}]   ;;  %s1321_s1 = inlined_call_operand.vmem [shape: bf16[32,128], index: 1, kind: input, shape index: {}]   ;;  %s1322_s2 = inlined_call_operand.vmem [shape: f32[1,128], index: 2, kind: input, shape index: {}]   ;;  %s1323_s3 = inlined_call_operand.vmem [shape: bf16[128,128], index: 3, kind: input, shape index: {}]   ;;  %s1324_s4 = inlined_call_operand.vmem [shape: f32[1,128], index: 4, kind: input, shape index: {}]   ;;  %s1325_s5 = inlined_call_operand.vmem [shape: bf16[128,128], index: 5, kind: input, shape index: {}]   ;;  %s1326_s6 = inlined_call_operand.vmem [shape: f32[1,128], index: 6, kind: input, shape index: {}]   ;;  %s1327_s7 = inlined_call_operand.hbm [shape: bf16[128,128], index: 7, kind: input, shape index: {}]   ;;  %s1328_s8 = inlined_call_operand.vmem [shape: f32[1,128], index: 8, kind: input, shape index: {}]   ;;  %s1329_s9 = inlined_call_operand.hbm [shape: f32[128,128], index: 9, kind: output, shape index: {}]  }
   0x1   :  { %15 = vsyncpa [#allocation4], 0  ;;  %s1130_s30 = smov [#allocation2]  }
   0x2   :  { %s35_s10 = sshll.u32 %s1130_s30, 4  ;;  %s36_s10 = int_to_ptr.vmem [resolvable:$true] %s35_s10 }
   0x3   :  { %s1094_s11 = scalar_lea.vmem %s36_s10, 1024  ;;  %p1099_p1 = scmp.lt.s32.totalorder %s36_s10, %s36_s10 }
   0x4   :  { %p1095_p0 = scmp.ne.s32.totalorder %s36_s10, %s1094_s11  ;;  %p1100_p2 = scmp.lt.s32.totalorder %s1094_s11, %s1094_s11 }
   0x6   :  { %p1101_p3 = por %p1100_p2, %p1099_p1 }
   0x8   :  { %p1102_p4 = pnand %p1101_p3, %p1095_p0 }
   0xa   :  { %1105 = shalt.err (!%p1102_p4)
}
   0xb   :  { %s1131_s12 = smov 64   ;;  %s1132_s13 = smov 4  }
   0xc   :  { %41 = dma.hbm_to_vmem [thread:$0]  %s1327_s7, 1024, %s36_s10, [#allocation3], %s1131_s12, %s1131_s12, %s1132_s13  }
   0xd   :  { %1126 = dma.done.wait [#allocation3], 1024  }
   0xe   :  { %1127 = vsyncadd [#allocation3], 4294966272  ;;  %v1060_v0 = vld [vmem:[%s1321_s1 + $0x8] sm:$0xff]   ;;  %v1061_v1 = vld [vmem:[%s1321_s1] sm:$0xff]   ;;  %vm95_vm0 = vcmask 261120  }
   0xf   :  { %922 = vmatprep.subr.bf16.mxu0 %v1060_v0  ;;  %v48_v2 = vld [vmem:[%s1320_s0] sm:$0xff]  ;;  %v49_v3 = vld [vmem:[%s1320_s0 + $0x8] sm:$0xff]  ;;  %v50_v5 = vld [vmem:[%s1320_s0 + $0x10] sm:$0xff] }
  0x10   :  { %923 = vmatpush3.bf16.msra.mxu0 %v1060_v0  ;;  %v64_v4 = vpack.c.bf16 %v49_v3, %v48_v2  ;;  %v51_v6 = vld [vmem:[%s1320_s0 + $0x18] sm:$0xff]  ;;  %v52_v7 = vld [vmem:[%s1320_s0 + $0x20] sm:$0xff]  ;;  %v53_v8 = vld [vmem:[%s1320_s0 + $0x28] sm:$0xff] }
  0x11   :  { %924 = vmatprep.subr.bf16.mxu0 %v1061_v1  ;;  %v65_v9 = vpack.c.bf16 %v51_v6, %v50_v5  ;;  %v66_v10 = vpack.c.bf16 %v53_v8, %v52_v7  ;;  %v1062_v11 = vld [vmem:[%s1323_s3 + $0x38] sm:$0xff]   ;;  %v54_v12 = vld [vmem:[%s1320_s0 + $0x30] sm:$0xff]  ;;  %v56_v15 = vld [vmem:[%s1320_s0 + $0x40] sm:$0xff] }
  0x12   :  { %926 = vmatprep.mubr.msk.bf16.mxu0 %vm95_vm0, %v64_v4  ;;  %v55_v13 = vld [vmem:[%s1320_s0 + $0x38] sm:$0xff]  ;;  %v1063_v14 = vld [vmem:[%s1323_s3 + $0x30] sm:$0xff]   ;;  %942 = vmatprep.subr.bf16.mxu1 %v1062_v11  ;;  %v57_v16 = vld [vmem:[%s1320_s0 + $0x48] sm:$0xff] }
  0x13   :  { %943 = vmatpush3.bf16.msra.mxu1 %v1062_v11  ;;  %v1064_v17 = vld [vmem:[%s1323_s3 + $0x28] sm:$0xff]   ;;  %v67_v18 = vpack.c.bf16 %v55_v13, %v54_v12  ;;  %v1065_v19 = vld [vmem:[%s1323_s3 + $0x20] sm:$0xff]   ;;  %v68_v20 = vpack.c.bf16 %v57_v16, %v56_v15  ;;  %v58_v21 = vld [vmem:[%s1320_s0 + $0x50] sm:$0xff] }
  0x14   :  { %925 = vmatpush3.bf16.msra.mxu0 %v1061_v1  ;;  %944 = vmatprep.subr.bf16.mxu1 %v1063_v14  ;;  %v59_v22 = vld [vmem:[%s1320_s0 + $0x58] sm:$0xff]  ;;  %v60_v23 = vld [vmem:[%s1320_s0 + $0x60] sm:$0xff]  ;;  %v61_v24 = vld [vmem:[%s1320_s0 + $0x68] sm:$0xff] }
  0x15   :  { %v1066_v25 = vld [vmem:[%s1323_s3 + $0x18] sm:$0xff]   ;;  %v69_v26 = vpack.c.bf16 %v59_v22, %v58_v21  ;;  %v70_v27 = vpack.c.bf16 %v61_v24, %v60_v23  ;;  %v62_v28 = vld [vmem:[%s1320_s0 + $0x70] sm:$0xff]  ;;  %v1068_v32 = vld [vmem:[%s1323_s3 + $0x8] sm:$0xff]  }
  0x16   :  { %v63_v29 = vld [vmem:[%s1320_s0 + $0x78] sm:$0xff]  ;;  %v1067_v31 = vld [vmem:[%s1323_s3 + $0x10] sm:$0xff]   ;;  %v1069_v33 = vld [vmem:[%s1323_s3] sm:$0xff]  }
  0x17   :  { %927 = vmatmul.mubr.msk.bf16.vlgmr.msra.gmra.mxu0 %vm95_vm0, %v65_v9  ;;  %945 = vmatpush3.bf16.msra.mxu1 %v1063_v14  ;;  %v71_v30 = vpack.c.bf16 %v63_v29, %v62_v28  ;;  %v1070_v34 = vld [vmem:[%s1325_s5 + $0x38] sm:$0xff]   ;;  %v1071_v35 = vld [vmem:[%s1325_s5 + $0x30] sm:$0xff]   ;;  %v1072_v36 = vld [vmem:[%s1325_s5 + $0x28] sm:$0xff]  }
  0x18   :  { %930 = vmatprep.mubr.msk.bf16.mxu0 %vm95_vm0, %v66_v10  ;;  %946 = vmatprep.subr.bf16.mxu1 %v1064_v17  ;;  %v1073_v37 = vld [vmem:[%s1325_s5 + $0x20] sm:$0xff]   ;;  %v1074_v38 = vld [vmem:[%s1325_s5 + $0x18] sm:$0xff]  }
  0x19   :  { %974 = vmatprep.subr.bf16.mxu0 %v1070_v34  ;;  %v826_v41 = vld [vmem:[%s1322_s2] ss:$0 sm:$0xff] }
  0x1a   :  { %975 = vmatpush3.bf16.msra.mxu0 %v1070_v34  ;;  %v1077_v34 = vld [vmem:[%s1325_s5] sm:$0xff]  }
  0x1b   :  { %947 = vmatpush3.bf16.msra.mxu1 %v1064_v17  ;;  %976 = vmatprep.subr.bf16.mxu0 %v1071_v35 }
  0x1c   :  { %948 = vmatprep.subr.bf16.mxu1 %v1065_v19 }
  0x1e   :  { %977 = vmatpush3.bf16.msra.mxu0 %v1071_v35  ;;  %v1078_v35 = vld [vmem:[#allocation2 + $0x38] sm:$0xff]  }
  0x1f   :  { %931 = vmatmul.mubr.msk.bf16.gmra.mxu0 %vm95_vm0, %v67_v18  ;;  %949 = vmatpush3.bf16.msra.mxu1 %v1065_v19 }
  0x20   :  { %934 = vmatprep.mubr.msk.bf16.mxu0 %vm95_vm0, %v68_v20  ;;  %950 = vmatprep.subr.bf16.mxu1 %v1066_v25 }
  0x21   :  { %978 = vmatprep.subr.bf16.mxu0 %v1072_v36 }
  0x22   :  { %979 = vmatpush3.bf16.msra.mxu0 %v1072_v36  ;;  %v1079_v36 = vld [vmem:[#allocation2 + $0x30] sm:$0xff]  }
  0x23   :  { %951 = vmatpush3.bf16.msra.mxu1 %v1066_v25  ;;  %980 = vmatprep.subr.bf16.mxu0 %v1073_v37 }
  0x24   :  { %952 = vmatprep.subr.bf16.mxu1 %v1067_v31 }
  0x26   :  { %981 = vmatpush3.bf16.msra.mxu0 %v1073_v37  ;;  %v1080_v37 = vld [vmem:[#allocation2 + $0x28] sm:$0xff]  }
  0x27   :  { %935 = vmatmul.mubr.msk.bf16.gmra.mxu0 %vm95_vm0, %v69_v26  ;;  %953 = vmatpush3.bf16.msra.mxu1 %v1067_v31 }
  0x28   :  { %938 = vmatprep.mubr.msk.bf16.mxu0 %vm95_vm0, %v70_v27  ;;  %954 = vmatprep.subr.bf16.mxu1 %v1068_v32 }
  0x29   :  { %982 = vmatprep.subr.bf16.mxu0 %v1074_v38 }
  0x2a   :  { %983 = vmatpush3.bf16.msra.mxu0 %v1074_v38  ;;  %v1081_v38 = vld [vmem:[#allocation2 + $0x20] sm:$0xff]  }
  0x2b   :  { %955 = vmatpush3.bf16.msra.mxu1 %v1068_v32  ;;  %v1075_v32 = vld [vmem:[%s1325_s5 + $0x10] sm:$0xff]  }
  0x2c   :  { %956 = vmatprep.subr.bf16.mxu1 %v1069_v33  ;;  %984 = vmatprep.subr.bf16.mxu0 %v1075_v32 }
  0x2e   :  { %985 = vmatpush3.bf16.msra.mxu0 %v1075_v32 }
  0x2f   :  { %939 = vmatmul.mubr.msk.bf16.gmra.mxu0 %vm95_vm0, %v71_v30  ;;  %957 = vmatpush3.bf16.msra.mxu1 %v1069_v33  ;;  %v1076_v33 = vld [vmem:[%s1325_s5 + $0x8] sm:$0xff]  }
  0x30   :  { %986 = vmatprep.subr.bf16.mxu0 %v1076_v33  ;;  %1038 = vmatprep.subr.bf16.mxu1 %v1078_v35 }
  0x32   :  { %987 = vmatpush3.bf16.msra.mxu0 %v1076_v33  ;;  %v1083_v33 = vld [vmem:[#allocation2 + $0x10] sm:$0xff]  }
  0x33   :  { %988 = vmatprep.subr.bf16.mxu0 %v1077_v34 }
  0x36   :  { %989 = vmatpush3.bf16.msra.mxu0 %v1077_v34  ;;  %v1084_v34 = vld [vmem:[#allocation2 + $0x8] sm:$0xff]  }
  0x37   :  { %1006 = vmatprep.subr.bf16.mxu0 %v1078_v35 }
  0xd7   :  { %v928_v39 = vpop.f32.mrf.mxu0 }
  0xd8   :  { %v163_v45 = vadd.f32 %v928_v39, %v826_v41  ;;  %v1302_v39 = vld [vmem:[#allocation2 + $0x18] sm:$0xff]  }
  0xd9   :  { %v154_v40 = vpop.f32.mrf.mxu0 }
  0xda   :  { %v155_v43 = vadd.f32 %v826_v41, %v154_v40  ;;  %v219_v52 = vmax.f32 %v163_v45, 0.0 }
  0xdb   :  { %v929_v42 = vpop.f32.mrf.mxu0 }
  0xdc   :  { %v166_v44 = vadd.f32 %v929_v42, %v826_v41  ;;  %v217_v50 = vmax.f32 %v155_v43, 0.0  ;;  %v837_v42 = vld [vmem:[%s1324_s4] ss:$0 sm:$0xff] }
  0xdd   :  { %v157_v46 = vpop.f32.mrf.mxu0 }
  0xde   :  { %v158_v47 = vadd.f32 %v826_v41, %v157_v46  ;;  %v220_v48 = vmax.f32 %v166_v44, 0.0 }
  0xdf   :  { %v932_v49 = vpop.f32.mrf.mxu0 }
  0xe0   :  { %v218_v51 = vmax.f32 %v158_v47, 0.0  ;;  %v234_v55 = vpack.c.bf16 %v220_v48, %v219_v52  ;;  %v179_v59 = vadd.f32 %v932_v49, %v826_v41 }
  0xe1   :  { %v170_v53 = vpop.f32.mrf.mxu0 }
  0xe2   :  { %v233_v54 = vpack.c.bf16 %v218_v51, %v217_v50  ;;  %v171_v57 = vadd.f32 %v826_v41, %v170_v53  ;;  %v223_v2 = vmax.f32 %v179_v59, 0.0 }
  0xe3   :  { %v933_v56 = vpop.f32.mrf.mxu0 }
  0xe4   :  { %v182_v58 = vadd.f32 %v933_v56, %v826_v41  ;;  %958 = vmatprep.mubr.bf16.mxu1 %v233_v54  ;;  %v221_v0 = vmax.f32 %v171_v57, 0.0 }
  0xe5   :  { %v173_v60 = vpop.f32.mrf.mxu0  ;;  %959 = vmatmul.mubr.bf16.vlgmr.msra.gmra.mxu1 %v234_v55 }
  0xe6   :  { %v174_v61 = vadd.f32 %v826_v41, %v173_v60  ;;  %v224_v62 = vmax.f32 %v182_v58, 0.0  ;;  %1046 = vmatpush3.bf16.msra.mxu1 %v1078_v35 }
  0xe7   :  { %v936_v63 = vpop.f32.mrf.mxu0  ;;  %1039 = vmatprep.subr.bf16.mxu1 %v1079_v36 }
  0xe8   :  { %v222_v1 = vmax.f32 %v174_v61, 0.0  ;;  %v236_v5 = vpack.c.bf16 %v224_v62, %v223_v2  ;;  %v195_v9 = vadd.f32 %v936_v63, %v826_v41 }
  0xe9   :  { %v186_v3 = vpop.f32.mrf.mxu0 }
  0xea   :  { %v235_v4 = vpack.c.bf16 %v222_v1, %v221_v0  ;;  %v187_v7 = vadd.f32 %v826_v41, %v186_v3  ;;  %v227_v16 = vmax.f32 %v195_v9, 0.0  ;;  %1047 = vmatpush3.bf16.msra.mxu1 %v1079_v36 }
  0xeb   :  { %v937_v6 = vpop.f32.mrf.mxu0  ;;  %1040 = vmatprep.subr.bf16.mxu1 %v1080_v37 }
  0xec   :  { %v198_v8 = vadd.f32 %v937_v6, %v826_v41  ;;  %962 = vmatprep.mubr.bf16.mxu1 %v235_v4  ;;  %v225_v14 = vmax.f32 %v187_v7, 0.0 }
  0xed   :  { %v189_v10 = vpop.f32.mrf.mxu0  ;;  %963 = vmatmul.mubr.bf16.gmra.mxu1 %v236_v5 }
  0xee   :  { %v190_v11 = vadd.f32 %v826_v41, %v189_v10  ;;  %v228_v12 = vmax.f32 %v198_v8, 0.0  ;;  %1048 = vmatpush3.bf16.msra.mxu1 %v1080_v37 }
  0xef   :  { %v940_v13 = vpop.f32.mrf.mxu0  ;;  %1041 = vmatprep.subr.bf16.mxu1 %v1081_v38 }
  0xf0   :  { %v226_v15 = vmax.f32 %v190_v11, 0.0  ;;  %v238_v19 = vpack.c.bf16 %v228_v12, %v227_v16  ;;  %v211_v23 = vadd.f32 %v940_v13, %v826_v41 }
  0xf1   :  { %v202_v17 = vpop.f32.mrf.mxu0 }
  0xf2   :  { %v237_v18 = vpack.c.bf16 %v226_v15, %v225_v14  ;;  %v203_v21 = vadd.f32 %v826_v41, %v202_v17  ;;  %v231_v29 = vmax.f32 %v211_v23, 0.0  ;;  %1049 = vmatpush3.bf16.msra.mxu1 %v1081_v38 }
  0xf3   :  { %v941_v20 = vpop.f32.mrf.mxu0  ;;  %1042 = vmatprep.subr.bf16.mxu1 %v1302_v39 }
  0xf4   :  { %v214_v22 = vadd.f32 %v941_v20, %v826_v41  ;;  %966 = vmatprep.mubr.bf16.mxu1 %v237_v18  ;;  %v229_v27 = vmax.f32 %v203_v21, 0.0 }
  0xf5   :  { %v205_v24 = vpop.f32.mrf.mxu0  ;;  %967 = vmatmul.mubr.bf16.gmra.mxu1 %v238_v19 }
  0xf6   :  { %v206_v25 = vadd.f32 %v826_v41, %v205_v24  ;;  %v232_v26 = vmax.f32 %v214_v22, 0.0  ;;  %1050 = vmatpush3.bf16.msra.mxu1 %v1302_v39 }
  0xf7   :  { %1043 = vmatprep.subr.bf16.mxu1 %v1083_v33 }
  0xf8   :  { %v230_v28 = vmax.f32 %v206_v25, 0.0  ;;  %v240_v31 = vpack.c.bf16 %v232_v26, %v231_v29 }
  0xfa   :  { %v239_v30 = vpack.c.bf16 %v230_v28, %v229_v27  ;;  %1051 = vmatpush3.bf16.msra.mxu1 %v1083_v33 }
  0xfb   :  { %1044 = vmatprep.subr.bf16.mxu1 %v1084_v34 }
  0xfc   :  { %970 = vmatprep.mubr.bf16.mxu1 %v239_v30 }
  0xfd   :  { %971 = vmatmul.mubr.bf16.gmra.mxu1 %v240_v31 }
  0xfe   :  { %1052 = vmatpush3.bf16.msra.mxu1 %v1084_v34 }
 0x1a5   :  { %v960_v40 = vpop.f32.mrf.mxu1 }
 0x1a6   :  { %v355_v46 = vadd.f32 %v960_v40, %v837_v42 }
 0x1a7   :  { %v346_v41 = vpop.f32.mrf.mxu1 }
 0x1a8   :  { %v347_v44 = vadd.f32 %v837_v42, %v346_v41  ;;  %v411_v53 = vmax.f32 %v355_v46, 0.0 }
 0x1a9   :  { %v961_v43 = vpop.f32.mrf.mxu1 }
 0x1aa   :  { %v358_v45 = vadd.f32 %v961_v43, %v837_v42  ;;  %v409_v51 = vmax.f32 %v347_v44, 0.0 }
 0x1ab   :  { %v349_v47 = vpop.f32.mrf.mxu1 }
 0x1ac   :  { %v350_v48 = vadd.f32 %v837_v42, %v349_v47  ;;  %v412_v49 = vmax.f32 %v358_v45, 0.0 }
 0x1ad   :  { %v964_v50 = vpop.f32.mrf.mxu1 }
 0x1ae   :  { %v410_v52 = vmax.f32 %v350_v48, 0.0  ;;  %v426_v56 = vpack.c.bf16 %v412_v49, %v411_v53  ;;  %v371_v60 = vadd.f32 %v964_v50, %v837_v42 }
 0x1af   :  { %v362_v54 = vpop.f32.mrf.mxu1 }
 0x1b0   :  { %v425_v55 = vpack.c.bf16 %v410_v52, %v409_v51  ;;  %v363_v58 = vadd.f32 %v837_v42, %v362_v54  ;;  %v415_v3 = vmax.f32 %v371_v60, 0.0 }
 0x1b1   :  { %v965_v57 = vpop.f32.mrf.mxu1 }
 0x1b2   :  { %v374_v59 = vadd.f32 %v965_v57, %v837_v42  ;;  %990 = vmatprep.mubr.bf16.mxu0 %v425_v55  ;;  %v413_v1 = vmax.f32 %v363_v58, 0.0 }
 0x1b3   :  { %v365_v61 = vpop.f32.mrf.mxu1  ;;  %991 = vmatmul.mubr.bf16.vlgmr.msra.gmra.mxu0 %v426_v56 }
 0x1b4   :  { %v366_v62 = vadd.f32 %v837_v42, %v365_v61  ;;  %1007 = vmatpush3.bf16.msra.mxu0 %v1078_v35  ;;  %v416_v63 = vmax.f32 %v374_v59, 0.0  ;;  %v1085_v35 = vld [vmem:[#allocation2] sm:$0xff]  }
 0x1b5   :  { %v968_v0 = vpop.f32.mrf.mxu1  ;;  %1008 = vmatprep.subr.bf16.mxu0 %v1079_v36  ;;  %1045 = vmatprep.subr.bf16.mxu1 %v1085_v35 }
 0x1b6   :  { %v414_v2 = vmax.f32 %v366_v62, 0.0  ;;  %v428_v6 = vpack.c.bf16 %v416_v63, %v415_v3  ;;  %v387_v10 = vadd.f32 %v968_v0, %v837_v42  ;;  %1053 = vmatpush3.bf16.msra.mxu1 %v1085_v35 }
 0x1b7   :  { %v378_v4 = vpop.f32.mrf.mxu1 }
 0x1b8   :  { %v427_v5 = vpack.c.bf16 %v414_v2, %v413_v1  ;;  %1009 = vmatpush3.bf16.msra.mxu0 %v1079_v36  ;;  %v379_v8 = vadd.f32 %v837_v42, %v378_v4  ;;  %v419_v17 = vmax.f32 %v387_v10, 0.0 }
 0x1b9   :  { %v969_v7 = vpop.f32.mrf.mxu1  ;;  %1010 = vmatprep.subr.bf16.mxu0 %v1080_v37 }
 0x1ba   :  { %v390_v9 = vadd.f32 %v969_v7, %v837_v42  ;;  %994 = vmatprep.mubr.bf16.mxu0 %v427_v5  ;;  %v417_v15 = vmax.f32 %v379_v8, 0.0 }
 0x1bb   :  { %v381_v11 = vpop.f32.mrf.mxu1  ;;  %995 = vmatmul.mubr.bf16.gmra.mxu0 %v428_v6 }
 0x1bc   :  { %v382_v12 = vadd.f32 %v837_v42, %v381_v11  ;;  %1011 = vmatpush3.bf16.msra.mxu0 %v1080_v37  ;;  %v420_v13 = vmax.f32 %v390_v9, 0.0 }
 0x1bd   :  { %v972_v14 = vpop.f32.mrf.mxu1  ;;  %1012 = vmatprep.subr.bf16.mxu0 %v1081_v38 }
 0x1be   :  { %v418_v16 = vmax.f32 %v382_v12, 0.0  ;;  %v430_v20 = vpack.c.bf16 %v420_v13, %v419_v17  ;;  %v403_v24 = vadd.f32 %v972_v14, %v837_v42 }
 0x1bf   :  { %v394_v18 = vpop.f32.mrf.mxu1 }
 0x1c0   :  { %v429_v19 = vpack.c.bf16 %v418_v16, %v417_v15  ;;  %1013 = vmatpush3.bf16.msra.mxu0 %v1081_v38  ;;  %v395_v22 = vadd.f32 %v837_v42, %v394_v18  ;;  %v423_v30 = vmax.f32 %v403_v24, 0.0  ;;  %v846_v38 = vld [vmem:[%s1326_s6] ss:$0 sm:$0xff] }
 0x1c1   :  { %v973_v21 = vpop.f32.mrf.mxu1  ;;  %1014 = vmatprep.subr.bf16.mxu0 %v1302_v39 }
 0x1c2   :  { %v406_v23 = vadd.f32 %v973_v21, %v837_v42  ;;  %998 = vmatprep.mubr.bf16.mxu0 %v429_v19  ;;  %v421_v28 = vmax.f32 %v395_v22, 0.0 }
 0x1c3   :  { %v397_v25 = vpop.f32.mrf.mxu1  ;;  %999 = vmatmul.mubr.bf16.gmra.mxu0 %v430_v20 }
 0x1c4   :  { %v398_v26 = vadd.f32 %v837_v42, %v397_v25  ;;  %1015 = vmatpush3.bf16.msra.mxu0 %v1302_v39  ;;  %v424_v27 = vmax.f32 %v406_v23, 0.0 }
 0x1c5   :  { %1016 = vmatprep.subr.bf16.mxu0 %v1083_v33 }
 0x1c6   :  { %v422_v29 = vmax.f32 %v398_v26, 0.0  ;;  %v432_v32 = vpack.c.bf16 %v424_v27, %v423_v30 }
 0x1c8   :  { %v431_v31 = vpack.c.bf16 %v422_v29, %v421_v28  ;;  %1017 = vmatpush3.bf16.msra.mxu0 %v1083_v33  ;;  %v855_v29 = vld [vmem:[%s1328_s8] ss:$0 sm:$0xff]  ;;  %s1133_s8 = smov [#allocation5]  }
 0x1c9   :  { %1018 = vmatprep.subr.bf16.mxu0 %v1084_v34  ;;  %s814_s17 = sshll.u32 %s1133_s8, 4  ;;  %s815_s17 = int_to_ptr.vmem [resolvable:$true] %s814_s17 }
 0x1ca   :  { %1002 = vmatprep.mubr.bf16.mxu0 %v431_v31  ;;  %s1106_s18 = scalar_lea.vmem %s815_s17, 2048  ;;  %p1111_p6 = scmp.lt.s32.totalorder %s815_s17, %s815_s17 }
 0x1cb   :  { %1003 = vmatmul.mubr.bf16.gmra.mxu0 %v432_v32  ;;  %p1107_p5 = scmp.ne.s32.totalorder %s815_s17, %s1106_s18  ;;  %p1112_p7 = scmp.lt.s32.totalorder %s1106_s18, %s1106_s18 }
 0x1cc   :  { %1019 = vmatpush3.bf16.msra.mxu0 %v1084_v34 }
 0x1cd   :  { %1020 = vmatprep.subr.bf16.mxu0 %v1085_v35  ;;  %p1113_p8 = por %p1112_p7, %p1111_p6 }
 0x1cf   :  { %p1114_p9 = pnand %p1113_p8, %p1107_p5 }
 0x1d0   :  { %1021 = vmatpush3.bf16.msra.mxu0 %v1085_v35 }
 0x273   :  { %v992_v36 = vpop.f32.mrf.mxu0 }
 0x274   :  { %v547_v42 = vadd.f32 %v992_v36, %v846_v38 }
 0x275   :  { %v538_v37 = vpop.f32.mrf.mxu0 }
 0x276   :  { %v539_v40 = vadd.f32 %v846_v38, %v538_v37  ;;  %v603_v49 = vmax.f32 %v547_v42, 0.0 }
 0x277   :  { %v993_v39 = vpop.f32.mrf.mxu0 }
 0x278   :  { %v550_v41 = vadd.f32 %v993_v39, %v846_v38  ;;  %v601_v47 = vmax.f32 %v539_v40, 0.0 }
 0x279   :  { %v541_v43 = vpop.f32.mrf.mxu0 }
 0x27a   :  { %v542_v44 = vadd.f32 %v846_v38, %v541_v43  ;;  %v604_v45 = vmax.f32 %v550_v41, 0.0 }
 0x27b   :  { %v996_v46 = vpop.f32.mrf.mxu0 }
 0x27c   :  { %v602_v48 = vmax.f32 %v542_v44, 0.0  ;;  %v618_v52 = vpack.c.bf16 %v604_v45, %v603_v49  ;;  %v563_v56 = vadd.f32 %v996_v46, %v846_v38 }
 0x27d   :  { %v554_v50 = vpop.f32.mrf.mxu0 }
 0x27e   :  { %v617_v51 = vpack.c.bf16 %v602_v48, %v601_v47  ;;  %v555_v54 = vadd.f32 %v846_v38, %v554_v50  ;;  %v607_v63 = vmax.f32 %v563_v56, 0.0 }
 0x27f   :  { %v997_v53 = vpop.f32.mrf.mxu0 }
 0x280   :  { %v566_v55 = vadd.f32 %v997_v53, %v846_v38  ;;  %1022 = vmatprep.mubr.bf16.mxu0 %v617_v51  ;;  %v605_v61 = vmax.f32 %v555_v54, 0.0 }
 0x281   :  { %v557_v57 = vpop.f32.mrf.mxu0  ;;  %1023 = vmatmul.mubr.bf16.vlgmr.msra.gmra.mxu0 %v618_v52 }
 0x282   :  { %v558_v58 = vadd.f32 %v846_v38, %v557_v57  ;;  %v608_v59 = vmax.f32 %v566_v55, 0.0 }
 0x283   :  { %v1000_v60 = vpop.f32.mrf.mxu0 }
 0x284   :  { %v606_v62 = vmax.f32 %v558_v58, 0.0  ;;  %v620_v2 = vpack.c.bf16 %v608_v59, %v607_v63  ;;  %v579_v6 = vadd.f32 %v1000_v60, %v846_v38 }
 0x285   :  { %v570_v0 = vpop.f32.mrf.mxu0 }
 0x286   :  { %v619_v1 = vpack.c.bf16 %v606_v62, %v605_v61  ;;  %v571_v4 = vadd.f32 %v846_v38, %v570_v0  ;;  %v611_v13 = vmax.f32 %v579_v6, 0.0 }
 0x287   :  { %v1001_v3 = vpop.f32.mrf.mxu0 }
 0x288   :  { %v582_v5 = vadd.f32 %v1001_v3, %v846_v38  ;;  %1026 = vmatprep.mubr.bf16.mxu1 %v619_v1  ;;  %v609_v11 = vmax.f32 %v571_v4, 0.0 }
 0x289   :  { %v573_v7 = vpop.f32.mrf.mxu0  ;;  %1027 = vmatmul.mubr.bf16.vlgmr.msra.gmra.mxu1 %v620_v2 }
 0x28a   :  { %v574_v8 = vadd.f32 %v846_v38, %v573_v7  ;;  %v612_v9 = vmax.f32 %v582_v5, 0.0 }
 0x28b   :  { %v1004_v10 = vpop.f32.mrf.mxu0 }
 0x28c   :  { %v610_v12 = vmax.f32 %v574_v8, 0.0  ;;  %v622_v16 = vpack.c.bf16 %v612_v9, %v611_v13  ;;  %v595_v20 = vadd.f32 %v1004_v10, %v846_v38 }
 0x28d   :  { %v586_v14 = vpop.f32.mrf.mxu0 }
 0x28e   :  { %v621_v15 = vpack.c.bf16 %v610_v12, %v609_v11  ;;  %v587_v18 = vadd.f32 %v846_v38, %v586_v14  ;;  %v615_v26 = vmax.f32 %v595_v20, 0.0 }
 0x28f   :  { %v1005_v17 = vpop.f32.mrf.mxu0 }
 0x290   :  { %v598_v19 = vadd.f32 %v1005_v17, %v846_v38  ;;  %1030 = vmatprep.mubr.bf16.mxu1 %v621_v15  ;;  %v613_v24 = vmax.f32 %v587_v18, 0.0 }
 0x291   :  { %v589_v21 = vpop.f32.mrf.mxu0  ;;  %1031 = vmatmul.mubr.bf16.gmra.mxu1 %v622_v16 }
 0x292   :  { %v590_v22 = vadd.f32 %v846_v38, %v589_v21  ;;  %v616_v23 = vmax.f32 %v598_v19, 0.0 }
 0x294   :  { %v614_v25 = vmax.f32 %v590_v22, 0.0  ;;  %v624_v28 = vpack.c.bf16 %v616_v23, %v615_v26 }
 0x296   :  { %v623_v27 = vpack.c.bf16 %v614_v25, %v613_v24 }
 0x298   :  { %1034 = vmatprep.mubr.bf16.mxu1 %v623_v27 }
 0x299   :  { %1035 = vmatmul.mubr.bf16.gmra.mxu1 %v624_v28 }
 0x341   :  { %v1024_v30 = vpop.f32.mrf.mxu0 }
 0x342   :  { %v739_v31 = vadd.f32 %v1024_v30, %v855_v29 }
 0x343   :  { %v730_v32 = vpop.f32.mrf.mxu0 }
 0x344   :  { %795 = vst [vmem:[#allocation5 + $0x10] sm:$0xff] %v739_v31  ;;  %v731_v33 = vadd.f32 %v855_v29, %v730_v32 }
 0x345   :  { %v1025_v34 = vpop.f32.mrf.mxu0 }
 0x346   :  { %793 = vst [vmem:[#allocation5] sm:$0xff] %v731_v33  ;;  %v742_v35 = vadd.f32 %v1025_v34, %v855_v29 }
 0x347   :  { %v733_v36 = vpop.f32.mrf.mxu0 }
 0x348   :  { %796 = vst [vmem:[#allocation5 + $0x18] sm:$0xff] %v742_v35  ;;  %v734_v37 = vadd.f32 %v855_v29, %v733_v36 }
 0x349   :  { %v1028_v38 = vpop.f32.mrf.mxu1 }
 0x34a   :  { %794 = vst [vmem:[#allocation5 + $0x8] sm:$0xff] %v734_v37  ;;  %v755_v39 = vadd.f32 %v1028_v38, %v855_v29 }
 0x34b   :  { %v746_v40 = vpop.f32.mrf.mxu1 }
 0x34c   :  { %799 = vst [vmem:[#allocation5 + $0x30] sm:$0xff] %v755_v39  ;;  %v747_v41 = vadd.f32 %v855_v29, %v746_v40 }
 0x34d   :  { %v1029_v42 = vpop.f32.mrf.mxu1 }
 0x34e   :  { %797 = vst [vmem:[#allocation5 + $0x20] sm:$0xff] %v747_v41  ;;  %v758_v43 = vadd.f32 %v1029_v42, %v855_v29 }
 0x34f   :  { %v749_v44 = vpop.f32.mrf.mxu1 }
 0x350   :  { %800 = vst [vmem:[#allocation5 + $0x38] sm:$0xff] %v758_v43  ;;  %v750_v45 = vadd.f32 %v855_v29, %v749_v44 }
 0x351   :  { %v1032_v46 = vpop.f32.mrf.mxu1 }
 0x352   :  { %798 = vst [vmem:[#allocation5 + $0x28] sm:$0xff] %v750_v45  ;;  %v771_v47 = vadd.f32 %v1032_v46, %v855_v29 }
 0x353   :  { %v762_v48 = vpop.f32.mrf.mxu1 }
 0x354   :  { %803 = vst [vmem:[#allocation5 + $0x50] sm:$0xff] %v771_v47  ;;  %v763_v49 = vadd.f32 %v855_v29, %v762_v48 }
 0x355   :  { %v1033_v50 = vpop.f32.mrf.mxu1 }
 0x356   :  { %801 = vst [vmem:[#allocation5 + $0x40] sm:$0xff] %v763_v49  ;;  %v774_v51 = vadd.f32 %v1033_v50, %v855_v29 }
 0x357   :  { %v765_v52 = vpop.f32.mrf.mxu1 }
 0x358   :  { %804 = vst [vmem:[#allocation5 + $0x58] sm:$0xff] %v774_v51  ;;  %v766_v53 = vadd.f32 %v855_v29, %v765_v52 }
 0x359   :  { %v1036_v54 = vpop.f32.mrf.mxu1 }
 0x35a   :  { %802 = vst [vmem:[#allocation5 + $0x48] sm:$0xff] %v766_v53  ;;  %v787_v55 = vadd.f32 %v1036_v54, %v855_v29 }
 0x35b   :  { %v778_v56 = vpop.f32.mrf.mxu1 }
 0x35c   :  { %807 = vst [vmem:[#allocation5 + $0x70] sm:$0xff] %v787_v55  ;;  %v779_v57 = vadd.f32 %v855_v29, %v778_v56 }
 0x35d   :  { %v1037_v58 = vpop.f32.mrf.mxu1 }
 0x35e   :  { %805 = vst [vmem:[#allocation5 + $0x60] sm:$0xff] %v779_v57  ;;  %v790_v59 = vadd.f32 %v1037_v58, %v855_v29 }
 0x35f   :  { %v781_v60 = vpop.f32.mrf.mxu1 }
 0x360   :  { %808 = vst [vmem:[#allocation5 + $0x78] sm:$0xff] %v790_v59  ;;  %v782_v61 = vadd.f32 %v855_v29, %v781_v60 }
 0x362   :  { %806 = vst [vmem:[#allocation5 + $0x68] sm:$0xff] %v782_v61 }
 0x363   :  { %1117 = shalt.err (!%p1114_p9)
}
 0x364   :  { %s1134_s19 = smov 128   ;;  %s1135_s20 = smov 8  }
 0x365   :  { %820 = dma.vmem_to_hbm [thread:$0]  %s815_s17, 2048, %s1329_s9, [#allocation4], %s1134_s19, %s1134_s19, %s1135_s20  }
 0x366   :  { %1128 = dma.done.wait [#allocation4], 2048  }
 0x367   :  { %1129 = vsyncadd [#allocation4], 4294965248 }
 0x368   :  { %824 = vsyncpa [#allocation3], 1 }
 0x369   :  { %825 = vsyncpa [#allocation4], 1 }

</bundles_post_ra>
